<compile_context>
chip_gen: v7x
topology: tpu7x:2x2x1
jax: 0.10.0
libtpu: 0.0.40
codegen_flags: <defaults>
</compile_context>

<pallas_src>
import math

import jax
import jax.numpy as jnp
from jax.experimental import pallas as pl
from jax.experimental.pallas import tpu as pltpu


def _round_up(x, m):
    return ((x + m - 1) // m) * m


def _lorentz_project(y, is_time, scale_exp):
    """Lorentz re-projection, mask-based (no lane-axis slices or concat).

    y:       (T, F) f32, lane 0 is the 'time' coordinate.
    is_time: (T, F) bool mask, True on lane 0 (hoisted by the caller so the
             iota + compare runs once per kernel invocation, not per call).
    """
    # Lane-0 value via masked cross-lane reduce (keeps vregs full-width; the
    # reduce goes to the XLU slot, not the VALU).
    y0 = jnp.sum(jnp.where(is_time, y, 0.0), axis=-1, keepdims=True)       # (T, 1)
    time = jax.nn.sigmoid(y0) * scale_exp + 1.0 + 0.0001                   # (T, 1)
    rest = jnp.where(is_time, 0.0, y)                                      # (T, F)
    denom = jnp.maximum(jnp.sum(rest * rest, axis=-1, keepdims=True), 1e-8)
    # sqrt((t^2-1)/denom) == sqrt(t^2-1) * rsqrt(denom); rsqrt routes to EUP.
    factor = jnp.sqrt(time * time - 1.0) * jax.lax.rsqrt(denom)            # (T, 1)
    return jnp.where(is_time, time, y * factor)                            # (T, F)


def lmlp_kernel(scales_ref, x_ref, w1_ref, b1_ref, w2_ref, b2_ref, o_ref):
    # scales_ref: SMEM (2,) f32 = exp(log_scale) of layer 1 / layer 2
    # (exponentiated once in the wrapper, not per grid step).
    scale1 = scales_ref[0]
    scale2 = scales_ref[1]

    x = x_ref[...].astype(jnp.float32)

    # Hoisted lane-index mask shared by both Lorentz projections.
    t = x.shape[0]
    fout = o_ref.shape[-1]
    lane = jax.lax.broadcasted_iota(jnp.int32, (t, fout), dimension=1)
    is_time = lane == 0

    # ---- linear1: nonlin = ReLU, dropout = identity (eval mode) ----
    h = jnp.maximum(x, 0.0)
    y1 = jnp.dot(h, w1_ref[...], preferred_element_type=jnp.float32) + b1_ref[...]
    h1 = _lorentz_project(y1, is_time, scale1)

    # ---- linear2: nonlin = None ----
    y2 = jnp.dot(h1, w2_ref[...], preferred_element_type=jnp.float32) + b2_ref[...]
    o_ref[...] = _lorentz_project(y2, is_time, scale2).astype(o_ref.dtype)


def _vmem_need_bytes(tile_n, fin, fout):
    item = 4  # f32
    io = 2 * tile_n * (fin + fout) * item                        # double-buffered x / out tiles
    params = 2 * (fin * fout + fout * fout + 2 * fout) * item    # resident params (2 buffers)
    scratch = 6 * tile_n * max(fin, fout) * item                 # kernel intermediates headroom
    return io + params + scratch


def _vmem_capacity_bytes():
    # Generation-aware: 128 MiB on v5e/v6e, 64 MiB per TC on v7x.
    try:
        return int(pltpu.get_tpu_info().vmem_capacity_bytes)
    except Exception:
        return 64 * 1024 * 1024  # conservative default (v7x)


def lmlp_forward(x, w1t, b1, w2t, b2, log_scales, *, tile_n=1024):
    """Fused LMLP forward.

    x: (N, Fin); w1t: (Fin, Fout); w2t: (Fout, Fout); b*: (1, Fout);
    log_scales: (2,) float32 (log-scale of layer 1 and layer 2).
    """
    N, Fin = x.shape
    Fout = w1t.shape[1]

    # Hoist the scalar exp() out of the kernel.
    scales_exp = jnp.exp(log_scales.astype(jnp.float32))

    # Batch tile: large (mem/overhead-bound kernel), multiple of 8 sublanes,
    # capped so the grid has >= ~8 steps (lets "parallel" shard the batch axis
    # across v7x's two TensorCores; no effect on single-TC v5e/v6e).
    tile_n = max(8, min(tile_n, _round_up(pl.cdiv(N, 8), 8)))

    vmem_cap = int(0.85 * _vmem_capacity_bytes())
    while tile_n > 8 and _vmem_need_bytes(tile_n, Fin, Fout) > vmem_cap:
        tile_n = max(8, tile_n // 2)
    need = _vmem_need_bytes(tile_n, Fin, Fout)
    # Never understate the computed requirement; keep headroom under capacity.
    vmem_limit = int(min(max(2 * need, 4 * 1024 * 1024), vmem_cap))

    # Ragged last tile is handled by Pallas (OOB reads padded, OOB stores
    # masked) -> no wrapper-side pad of x and no out[:N] slice, which would
    # each add a full extra HBM pass on a bandwidth-bound kernel.
    grid = (pl.cdiv(N, tile_n),)

    return pl.pallas_call(
        lmlp_kernel,
        out_shape=jax.ShapeDtypeStruct((N, Fout), x.dtype),
        grid_spec=pltpu.PrefetchScalarGridSpec(
            num_scalar_prefetch=1,           # scales_exp -> SMEM
            grid=grid,
            in_specs=[
                # x: tiled over the batch axis.
                pl.BlockSpec((tile_n, Fin), lambda i, s: (i, 0)),
                # Weights / biases: constant block index -> DMA'd once and
                # kept VMEM-resident across all grid steps.
                # TODO(synk): at production Fin/Fout, mark these
                # pipeline_mode=pl.Buffered(1) to halve their VMEM footprint.
                pl.BlockSpec((Fin, Fout), lambda i, s: (0, 0)),
                pl.BlockSpec((1, Fout), lambda i, s: (0, 0)),
                pl.BlockSpec((Fout, Fout), lambda i, s: (0, 0)),
                pl.BlockSpec((1, Fout), lambda i, s: (0, 0)),
            ],
            out_specs=pl.BlockSpec((tile_n, Fout), lambda i, s: (i, 0)),
        ),
        compiler_params=pltpu.CompilerParams(
            dimension_semantics=("parallel",),
            vmem_limit_bytes=vmem_limit,
        ),
    )(scales_exp, x, w1t, b1, w2t, b2)
    # TODO(synk): production-size path: if Fout >= 128, add a second grid axis
    # over output features (tile 256 on v6e/v7x, 128 on v5e, full Fin resident)
    # and feed the MXU bf16 operands (f32 Lorentz math); if Fout stays ~32,
    # the dominant lever is lane-dense packing (4 batch rows per 128-lane slab).


def lmlp_reference(x, w1t, b1, w2t, b2, log_scales):
    """Pure-JAX reference mirroring the PyTorch forward (eval mode)."""
    def lorentz(y, log_s):
        time = jax.nn.sigmoid(y[:, :1]) * jnp.exp(log_s) + 1.0 + 0.0001
        rest = y[:, 1:]
        denom = jnp.maximum(jnp.sum(rest * rest, -1, keepdims=True), 1e-8)
        return jnp.concatenate(
            [time, rest * jnp.sqrt((time * time - 1.0) / denom)], axis=-1
        )

    h = jnp.maximum(x, 0.0)
    h1 = lorentz(h @ w1t + b1, log_scales[0])
    return lorentz(h1 @ w2t + b2, log_scales[1])


def init_lorentz_linear(key, in_features, out_features):
    """Matches LorentzLinear.reset_parameters:
    W ~ U(-1/sqrt(out), 1/sqrt(out)), column 0 zeroed, bias = 0, scale = log(10)."""
    stdv = 1.0 / math.sqrt(out_features)
    w = jax.random.uniform(
        key, (out_features, in_features), jnp.float32, minval=-stdv, maxval=stdv
    )
    # step = in_features -> only column idx 0 is zeroed
    w = w.at[:, 0].set(0.0)
    b = jnp.zeros((1, out_features), jnp.float32)
    wt = jnp.transpose(w)  # (in, out) so the kernel computes x @ Wt
    log_scale = jnp.float32(math.log(10.0))
    return wt, b, log_scale


if __name__ == "__main__":
    key = jax.random.PRNGKey(0)
    k1, k2, kx1, kx2 = jax.random.split(key, 4)

    IN_F, OUT_F = 32, 32
    w1t, b1, ls1 = init_lorentz_linear(k1, IN_F, OUT_F)
    w2t, b2, ls2 = init_lorentz_linear(k2, OUT_F, OUT_F)
    log_scales = jnp.stack([ls1, ls2])

    # Exercise both the evenly-divisible path and the ragged-last-tile path.
    for n, kx in ((8, kx1), (13, kx2)):
        x = jax.random.normal(kx, (n, IN_F), dtype=jnp.float32)

        out = lmlp_forward(x, w1t, b1, w2t, b2, log_scales)
        jax.block_until_ready(out)

        ref = lmlp_reference(x, w1t, b1, w2t, b2, log_scales)

        assert out.shape == (n, OUT_F)
        assert bool(jnp.all(jnp.isfinite(out)))
        max_err = float(jnp.max(jnp.abs(out - ref)))
        assert jnp.allclose(out, ref, rtol=2e-3, atol=2e-3), max_err

    print("KERNEL_OK")
</pallas_src>

<mosaic_0001>
module attributes {stable_mosaic.version = 11 : i64} {
  func.func @lmlp_kernel(%arg0: i32, %arg1: memref<2xf32, #tpu.memory_space<smem>>, %arg2: memref<8x32xf32, #tpu.memory_space<vmem>>, %arg3: memref<32x32xf32, #tpu.memory_space<vmem>>, %arg4: memref<1x32xf32, #tpu.memory_space<vmem>>, %arg5: memref<32x32xf32, #tpu.memory_space<vmem>>, %arg6: memref<1x32xf32, #tpu.memory_space<vmem>>, %arg7: memref<8x32xf32, #tpu.memory_space<vmem>>) attributes {dimension_semantics = [#tpu.dimension_semantics<parallel>], iteration_bounds = array<i64: 1>, scalar_prefetch = 1 : i64, scratch_operands = 0 : i64, tpu.core_type = #tpu.core_type<tc>, window_params = [{transform_indices = @transform_0, window_bounds = array<i64: 8, 32>}, {pipeline_mode = #tpu.pipeline_mode<synchronous>, transform_indices = @transform_1, window_bounds = array<i64: 32, 32>}, {pipeline_mode = #tpu.pipeline_mode<synchronous>, transform_indices = @transform_2, window_bounds = array<i64: 1, 32>}, {pipeline_mode = #tpu.pipeline_mode<synchronous>, transform_indices = @transform_3, window_bounds = array<i64: 32, 32>}, {pipeline_mode = #tpu.pipeline_mode<synchronous>, transform_indices = @transform_4, window_bounds = array<i64: 1, 32>}, {transform_indices = @transform_5, window_bounds = array<i64: 8, 32>}]} {
    %c0 = arith.constant 0 : index
    %0 = memref.load %arg1[%c0] : memref<2xf32, #tpu.memory_space<smem>>
    %c1 = arith.constant 1 : index
    %1 = memref.load %arg1[%c1] : memref<2xf32, #tpu.memory_space<smem>>
    %c0_0 = arith.constant 0 : index
    %c0_1 = arith.constant 0 : index
    %2 = vector.load %arg2[%c0_0, %c0_1] : memref<8x32xf32, #tpu.memory_space<vmem>>, vector<8x32xf32>
    %3 = tpu.iota {dimensions = array<i32: 1>} : vector<8x32xi32>
    %c0_i32 = arith.constant 0 : i32
    %4 = vector.broadcast %c0_i32 : i32 to vector<8x32xi32>
    %5 = arith.cmpi eq, %3, %4 : vector<8x32xi32>
    %cst = arith.constant 0.000000e+00 : f32
    %6 = vector.broadcast %cst : f32 to vector<8x32xf32>
    %7 = arith.maximumf %2, %6 : vector<8x32xf32>
    %c0_2 = arith.constant 0 : index
    %c0_3 = arith.constant 0 : index
    %8 = vector.load %arg3[%c0_2, %c0_3] : memref<32x32xf32, #tpu.memory_space<vmem>>, vector<32x32xf32>
    %cst_4 = arith.constant dense<0.000000e+00> : vector<8x32xf32>
    %9 = tpu.matmul %7, %8, %cst_4 {dimension_numbers = #tpu.dot_dimension_numbers<[1], [0], [0], [1], [0, 0, 1, 1], [], []>} : vector<8x32xf32>, vector<32x32xf32>, vector<8x32xf32> -> vector<8x32xf32>
    %c0_5 = arith.constant 0 : index
    %c0_6 = arith.constant 0 : index
    %10 = vector.load %arg4[%c0_5, %c0_6] : memref<1x32xf32, #tpu.memory_space<vmem>>, vector<1x32xf32>
    %11 = vector.broadcast %10 : vector<1x32xf32> to vector<8x32xf32>
    %12 = arith.addf %9, %11 : vector<8x32xf32>
    %cst_7 = arith.constant 0.000000e+00 : f32
    %13 = vector.broadcast %cst_7 : f32 to vector<8x32xf32>
    %14 = arith.select %5, %12, %13 : vector<8x32xi1>, vector<8x32xf32>
    %cst_8 = arith.constant dense<0.000000e+00> : vector<8xf32>
    %15 = vector.multi_reduction <add>, %14, %cst_8 [1] : vector<8x32xf32> to vector<8xf32>
    %16 = vector.shape_cast %15 : vector<8xf32> to vector<8x1xf32>
    %17 = arith.negf %16 : vector<8x1xf32>
    %18 = math.exp %17 : vector<8x1xf32>
    %cst_9 = arith.constant 1.000000e+00 : f32
    %19 = vector.broadcast %cst_9 : f32 to vector<8x1xf32>
    %20 = arith.addf %19, %18 : vector<8x1xf32>
    %21 = arith.divf %19, %20 : vector<8x1xf32>
    %22 = vector.broadcast %0 : f32 to vector<8x1xf32>
    %23 = arith.mulf %21, %22 : vector<8x1xf32>
    %cst_10 = arith.constant 1.000000e+00 : f32
    %24 = vector.broadcast %cst_10 : f32 to vector<8x1xf32>
    %25 = arith.addf %23, %24 : vector<8x1xf32>
    %cst_11 = arith.constant 9.99999974E-5 : f32
    %26 = vector.broadcast %cst_11 : f32 to vector<8x1xf32>
    %27 = arith.addf %25, %26 : vector<8x1xf32>
    %cst_12 = arith.constant 0.000000e+00 : f32
    %28 = vector.broadcast %cst_12 : f32 to vector<8x32xf32>
    %29 = arith.select %5, %28, %12 : vector<8x32xi1>, vector<8x32xf32>
    %30 = arith.mulf %29, %29 : vector<8x32xf32>
    %cst_13 = arith.constant dense<0.000000e+00> : vector<8xf32>
    %31 = vector.multi_reduction <add>, %30, %cst_13 [1] : vector<8x32xf32> to vector<8xf32>
    %32 = vector.shape_cast %31 : vector<8xf32> to vector<8x1xf32>
    %cst_14 = arith.constant 9.99999993E-9 : f32
    %33 = vector.broadcast %cst_14 : f32 to vector<8x1xf32>
    %34 = arith.maximumf %32, %33 : vector<8x1xf32>
    %35 = arith.mulf %27, %27 : vector<8x1xf32>
    %cst_15 = arith.constant 1.000000e+00 : f32
    %36 = vector.broadcast %cst_15 : f32 to vector<8x1xf32>
    %37 = arith.subf %35, %36 : vector<8x1xf32>
    %38 = math.sqrt %37 : vector<8x1xf32>
    %39 = math.rsqrt %34 : vector<8x1xf32>
    %40 = arith.mulf %38, %39 : vector<8x1xf32>
    %41 = vector.broadcast %40 : vector<8x1xf32> to vector<8x32xf32>
    %42 = arith.mulf %12, %41 : vector<8x32xf32>
    %43 = vector.shape_cast %27 : vector<8x1xf32> to vector<8x1xf32>
    %44 = vector.broadcast %43 : vector<8x1xf32> to vector<8x32xf32>
    %45 = arith.select %5, %44, %42 : vector<8x32xi1>, vector<8x32xf32>
    %c0_16 = arith.constant 0 : index
    %c0_17 = arith.constant 0 : index
    %46 = vector.load %arg5[%c0_16, %c0_17] : memref<32x32xf32, #tpu.memory_space<vmem>>, vector<32x32xf32>
    %cst_18 = arith.constant dense<0.000000e+00> : vector<8x32xf32>
    %47 = tpu.matmul %45, %46, %cst_18 {dimension_numbers = #tpu.dot_dimension_numbers<[1], [0], [0], [1], [0, 0, 1, 1], [], []>} : vector<8x32xf32>, vector<32x32xf32>, vector<8x32xf32> -> vector<8x32xf32>
    %c0_19 = arith.constant 0 : index
    %c0_20 = arith.constant 0 : index
    %48 = vector.load %arg6[%c0_19, %c0_20] : memref<1x32xf32, #tpu.memory_space<vmem>>, vector<1x32xf32>
    %49 = vector.broadcast %48 : vector<1x32xf32> to vector<8x32xf32>
    %50 = arith.addf %47, %49 : vector<8x32xf32>
    %cst_21 = arith.constant 0.000000e+00 : f32
    %51 = vector.broadcast %cst_21 : f32 to vector<8x32xf32>
    %52 = arith.select %5, %50, %51 : vector<8x32xi1>, vector<8x32xf32>
    %cst_22 = arith.constant dense<0.000000e+00> : vector<8xf32>
    %53 = vector.multi_reduction <add>, %52, %cst_22 [1] : vector<8x32xf32> to vector<8xf32>
    %54 = vector.shape_cast %53 : vector<8xf32> to vector<8x1xf32>
    %55 = arith.negf %54 : vector<8x1xf32>
    %56 = math.exp %55 : vector<8x1xf32>
    %cst_23 = arith.constant 1.000000e+00 : f32
    %57 = vector.broadcast %cst_23 : f32 to vector<8x1xf32>
    %58 = arith.addf %57, %56 : vector<8x1xf32>
    %59 = arith.divf %57, %58 : vector<8x1xf32>
    %60 = vector.broadcast %1 : f32 to vector<8x1xf32>
    %61 = arith.mulf %59, %60 : vector<8x1xf32>
    %cst_24 = arith.constant 1.000000e+00 : f32
    %62 = vector.broadcast %cst_24 : f32 to vector<8x1xf32>
    %63 = arith.addf %61, %62 : vector<8x1xf32>
    %cst_25 = arith.constant 9.99999974E-5 : f32
    %64 = vector.broadcast %cst_25 : f32 to vector<8x1xf32>
    %65 = arith.addf %63, %64 : vector<8x1xf32>
    %cst_26 = arith.constant 0.000000e+00 : f32
    %66 = vector.broadcast %cst_26 : f32 to vector<8x32xf32>
    %67 = arith.select %5, %66, %50 : vector<8x32xi1>, vector<8x32xf32>
    %68 = arith.mulf %67, %67 : vector<8x32xf32>
    %cst_27 = arith.constant dense<0.000000e+00> : vector<8xf32>
    %69 = vector.multi_reduction <add>, %68, %cst_27 [1] : vector<8x32xf32> to vector<8xf32>
    %70 = vector.shape_cast %69 : vector<8xf32> to vector<8x1xf32>
    %cst_28 = arith.constant 9.99999993E-9 : f32
    %71 = vector.broadcast %cst_28 : f32 to vector<8x1xf32>
    %72 = arith.maximumf %70, %71 : vector<8x1xf32>
    %73 = arith.mulf %65, %65 : vector<8x1xf32>
    %cst_29 = arith.constant 1.000000e+00 : f32
    %74 = vector.broadcast %cst_29 : f32 to vector<8x1xf32>
    %75 = arith.subf %73, %74 : vector<8x1xf32>
    %76 = math.sqrt %75 : vector<8x1xf32>
    %77 = math.rsqrt %72 : vector<8x1xf32>
    %78 = arith.mulf %76, %77 : vector<8x1xf32>
    %79 = vector.broadcast %78 : vector<8x1xf32> to vector<8x32xf32>
    %80 = arith.mulf %50, %79 : vector<8x32xf32>
    %81 = vector.shape_cast %65 : vector<8x1xf32> to vector<8x1xf32>
    %82 = vector.broadcast %81 : vector<8x1xf32> to vector<8x32xf32>
    %83 = arith.select %5, %82, %80 : vector<8x32xi1>, vector<8x32xf32>
    %c0_30 = arith.constant 0 : index
    %c0_31 = arith.constant 0 : index
    %84 = vector.load %arg7[%c0_30, %c0_31] : memref<8x32xf32, #tpu.memory_space<vmem>>, vector<8x32xf32>
    tpu.vector_store %arg7[%c0_30, %c0_31], %83 {strides = array<i32>} : memref<8x32xf32, #tpu.memory_space<vmem>>, vector<8x32xf32>,
    return
  }
  func.func @transform_0(%arg0: i32, %arg1: memref<2xf32, #tpu.memory_space<smem>>) -> (i32, i32) {
    %c0_i32 = arith.constant 0 : i32
    %c0_i32_0 = arith.constant 0 : i32
    return %arg0, %c0_i32 : i32, i32
  }
  func.func @transform_1(%arg0: i32, %arg1: memref<2xf32, #tpu.memory_space<smem>>) -> (i32, i32) {
    %c0_i32 = arith.constant 0 : i32
    %c0_i32_0 = arith.constant 0 : i32
    %c0_i32_1 = arith.constant 0 : i32
    return %c0_i32, %c0_i32_0 : i32, i32
  }
  func.func @transform_2(%arg0: i32, %arg1: memref<2xf32, #tpu.memory_space<smem>>) -> (i32, i32) {
    %c0_i32 = arith.constant 0 : i32
    %c0_i32_0 = arith.constant 0 : i32
    %c0_i32_1 = arith.constant 0 : i32
    return %c0_i32, %c0_i32_0 : i32, i32
  }
  func.func @transform_3(%arg0: i32, %arg1: memref<2xf32, #tpu.memory_space<smem>>) -> (i32, i32) {
    %c0_i32 = arith.constant 0 : i32
    %c0_i32_0 = arith.constant 0 : i32
    %c0_i32_1 = arith.constant 0 : i32
    return %c0_i32, %c0_i32_0 : i32, i32
  }
  func.func @transform_4(%arg0: i32, %arg1: memref<2xf32, #tpu.memory_space<smem>>) -> (i32, i32) {
    %c0_i32 = arith.constant 0 : i32
    %c0_i32_0 = arith.constant 0 : i32
    %c0_i32_1 = arith.constant 0 : i32
    return %c0_i32, %c0_i32_0 : i32, i32
  }
  func.func @transform_5(%arg0: i32, %arg1: memref<2xf32, #tpu.memory_space<smem>>) -> (i32, i32) {
    %c0_i32 = arith.constant 0 : i32
    %c0_i32_0 = arith.constant 0 : i32
    return %arg0, %c0_i32 : i32, i32
  }
}

</mosaic_0001>

<bundles_post_ra>
// kernel: tpu_custom_call.1
= control target key start
LH: loop header
LB: loop body
LE: loop exit
PB: predicated region body
PF: predicated region fallthrough
CT: control target
= control target key end

     0   :  { %s648_s0 = inlined_call_operand.hbm [shape: f32[2], index: 0, kind: input, shape index: {}]   ;;  %s649_s1 = inlined_call_operand.hbm [shape: f32[8,32], index: 1, kind: input, shape index: {}]   ;;  %s650_s2 = inlined_call_operand.hbm [shape: f32[32,32], index: 2, kind: input, shape index: {}]   ;;  %s651_s3 = inlined_call_operand.vmem [shape: f32[1,32], index: 3, kind: input, shape index: {}]   ;;  %s652_s4 = inlined_call_operand.hbm [shape: f32[32,32], index: 4, kind: input, shape index: {}]   ;;  %s653_s5 = inlined_call_operand.vmem [shape: f32[1,32], index: 5, kind: input, shape index: {}]   ;;  %s654_s6 = inlined_call_operand.hbm [shape: f32[8,32], index: 6, kind: output, shape index: {}]  }
   0x1   :  { %s403_s23 = scalar_lea.hbm %s648_s0, 16 }
   0x2   :  { %p404_p0 = scmp.ne.s32.totalorder %s648_s0, %s403_s23  ;;  %p407_p1 = scmp.lt.u32.totalorder %s403_s23, %s648_s0 }
   0x4   :  { %p409_p2 = pnand %p407_p1, %p404_p0 }
   0x6   :  { %412 = shalt.err (!%p409_p2)  }
   0x7   :  { %s509_s28 = smov [#allocation3]  }
   0x8   :  { %12 = dma.hbm_to_smem %s648_s0, 16, %s509_s28, [#allocation2] }
   0x9   :  { %501 = dma.done.wait [#allocation2], 16 }
   0xa   :  { %502 = vsyncadd [#allocation2], 4294967280 }
   0xb   :  { %14 = sfence }
   0xc   :  { %15 = vsyncpa [#allocation5], 0 }
   0xd   :  { %16 = vsyncpa [#allocation8], 0 }
   0xe   :  { %17 = vsyncpa [#allocation6], 0  ;;  %s510_s7 = smov [#allocation7]   ;;  %s413_s11 = scalar_lea.hbm %s650_s2, 512 }
   0xf   :  { %s33_s8 = sshll.u32 %s510_s7, 4  ;;  %p414_p3 = scmp.ne.s32.totalorder %s650_s2, %s413_s11  ;;  %s34_s8 = int_to_ptr.vmem [resolvable:$true] %s33_s8 }
  0x10   :  { %p417_p4 = scmp.lt.u32.totalorder %s413_s11, %s650_s2 }
  0x12   :  { %p419_p5 = pnand %p417_p4, %p414_p3 }
  0x14   :  { %422 = shalt.err (!%p419_p5)
}
  0x15   :  { %s423_s0 = scalar_lea.vmem %s34_s8, 512  ;;  %p428_p7 = scmp.lt.s32.totalorder %s34_s8, %s34_s8 }
  0x16   :  { %p424_p6 = scmp.ne.s32.totalorder %s34_s8, %s423_s0  ;;  %p429_p8 = scmp.lt.s32.totalorder %s423_s0, %s423_s0 }
  0x18   :  { %p430_p9 = por %p429_p8, %p428_p7 }
  0x1a   :  { %p431_p10 = pnand %p430_p9, %p424_p6 }
  0x1c   :  { %434 = shalt.err (!%p431_p10)
}
  0x1d   :  { %s511_s16 = smov 128   ;;  %s512_s17 = smov 8  }
  0x1e   :  { %39 = dma.hbm_to_vmem [thread:$0]  %s650_s2, 512, %s34_s8, [#allocation8], %s511_s16, %s511_s16, %s512_s17  }
  0x1f   :  { %s513_s20 = smov [#allocation4]   ;;  %s514_s22 = smov [#allocation9]  }
  0x20   :  { %s24_s21 = sshll.u32 %s513_s20, 4  ;;  %s47_s23 = sshll.u32 %s514_s22, 4  ;;  %s25_s21 = int_to_ptr.vmem [resolvable:$true] %s24_s21  ;;  %s48_s23 = int_to_ptr.vmem [resolvable:$true] %s47_s23 }
  0x21   :  { %s435_s26 = scalar_lea.hbm %s649_s1, 128 }
  0x22   :  { %p436_p11 = scmp.ne.s32.totalorder %s649_s1, %s435_s26  ;;  %p439_p12 = scmp.lt.u32.totalorder %s435_s26, %s649_s1 }
  0x24   :  { %p441_p13 = pnand %p439_p12, %p436_p11 }
  0x26   :  { %444 = shalt.err (!%p441_p13)
}
  0x27   :  { %s445_s2 = scalar_lea.vmem %s25_s21, 128  ;;  %p450_p1 = scmp.lt.s32.totalorder %s25_s21, %s25_s21 }
  0x28   :  { %p446_p0 = scmp.ne.s32.totalorder %s25_s21, %s445_s2  ;;  %p451_p2 = scmp.lt.s32.totalorder %s445_s2, %s445_s2 }
  0x2a   :  { %p452_p3 = por %p451_p2, %p450_p1 }
  0x2c   :  { %p453_p4 = pnand %p452_p3, %p446_p0 }
  0x2e   :  { %456 = shalt.err (!%p453_p4)
}
  0x2f   :  { %27 = dma.hbm_to_vmem [thread:$0]  %s649_s1, 128, %s25_s21, [#allocation5]  }
  0x30   :  { %s457_s11 = scalar_lea.hbm %s652_s4, 512 }
  0x31   :  { %p458_p5 = scmp.ne.s32.totalorder %s652_s4, %s457_s11  ;;  %p461_p6 = scmp.lt.u32.totalorder %s457_s11, %s652_s4 }
  0x33   :  { %p463_p7 = pnand %p461_p6, %p458_p5 }
  0x35   :  { %466 = shalt.err (!%p463_p7)
}
  0x36   :  { %s467_s0 = scalar_lea.vmem %s48_s23, 512  ;;  %p472_p9 = scmp.lt.s32.totalorder %s48_s23, %s48_s23 }
  0x37   :  { %p468_p8 = scmp.ne.s32.totalorder %s48_s23, %s467_s0  ;;  %p473_p10 = scmp.lt.s32.totalorder %s467_s0, %s467_s0 }
  0x39   :  { %p474_p11 = por %p473_p10, %p472_p9 }
  0x3b   :  { %p475_p12 = pnand %p474_p11, %p468_p8 }
  0x3d   :  { %478 = shalt.err (!%p475_p12)
}
  0x3e   :  { %53 = dma.hbm_to_vmem [thread:$0]  %s652_s4, 512, %s48_s23, [#allocation8], %s511_s16, %s511_s16, %s512_s17  }
  0x3f   :  { %503 = dma.done.wait [#allocation5], 128  }
  0x40   :  { %504 = vsyncadd [#allocation5], 4294967168 }
  0x41   :  { %505 = dma.done.wait [#allocation8], 1024  }
  0x42   :  { %506 = vsyncadd [#allocation8], 4294966272  ;;  %v515_v0 = vmov 0.0|0.0   ;;  %vm516_vm0 = vmmov 0   ;;  %v517_v1 = vmov 0.0   ;;  %v72_v2 = vld [vmem:[#allocation7] sm:$0xff]  ;;  %v68_v10 = vlaneseq }
  0x43   :  { %365 = vmatprep.subr.bf16.mxu0 %v515_v0  ;;  %351 = vmatprep.mubr.msk.f32.mxu0 %vm516_vm0, %v517_v1  ;;  %v73_v3 = vld [vmem:[#allocation7 + $0x8] sm:$0xff]  ;;  %v74_v4 = vld [vmem:[#allocation7 + $0x10] sm:$0xff]  ;;  %v75_v6 = vld [vmem:[#allocation7 + $0x18] sm:$0xff]  ;;  %vm83_vm1 = vcmask 261120   ;;  %s518_s20 = smov [#allocation10]  }
  0x44   :  { %371 = vmatprep.subr.bf16.mxu1 %v515_v0  ;;  %362 = vmatprep.mubr.msk.f32.mxu1 %vm516_vm0, %v517_v1  ;;  %v366_v5 = vpack.c.bf16 %v73_v3, %v72_v2  ;;  %v369_v7 = vpack.c.bf16 %v75_v6, %v74_v4  ;;  %v67_v8 = vld [vmem:[#allocation4] sm:$0xff]  ;;  %v609_v11 = vand.u32 127, %v68_v10  ;;  %v190_v21 = vld [vmem:[#allocation9] sm:$0xff]  ;;  %v191_v22 = vld [vmem:[#allocation9 + $0x8] sm:$0xff]  ;;  %s314_s21 = sshll.u32 %s518_s20, 4  ;;  %s315_s21 = int_to_ptr.vmem [resolvable:$true] %s314_s21 }
  0x45   :  { %v71_v9 = vmax.f32 %v67_v8, 0.0  ;;  %v325_v12 = vld [vmem:[%s651_s3] ss:$0 sm:$0xff]  ;;  %v192_v23 = vld [vmem:[#allocation9 + $0x10] sm:$0xff]  ;;  %v372_v24 = vpack.c.bf16 %v191_v22, %v190_v21  ;;  %s65_s3 = sld [smem:[#allocation3]]  ;;  %s479_s22 = scalar_lea.vmem %s315_s21, 128 }
  0x46   :  { %367 = vmatpush3.bf16.msra.mxu0 %v366_v5  ;;  %vm70_vm2 = vcmp.eq.s32.totalorder %v609_v11, 0  ;;  %v193_v25 = vld [vmem:[#allocation9 + $0x18] sm:$0xff]  ;;  %p480_p13 = scmp.ne.s32.totalorder %s315_s21, %s479_s22  ;;  %p484_p0 = scmp.lt.s32.totalorder %s315_s21, %s315_s21 }
  0x47   :  { %368 = vmatprep.subr.bf16.mxu0 %v515_v0  ;;  %373 = vmatpush3.bf16.msra.mxu1 %v372_v24  ;;  %v375_v26 = vpack.c.bf16 %v193_v25, %v192_v23  ;;  %v329_v49 = vld [vmem:[%s653_s5] ss:$0 sm:$0xff]  ;;  %s324_s5 = sld [smem:[#allocation3 + $0x1]]  ;;  %p485_p1 = scmp.lt.s32.totalorder %s479_s22, %s479_s22 }
  0x48   :  { %374 = vmatprep.subr.bf16.mxu1 %v515_v0 }
  0x49   :  { %p486_p2 = por %p485_p1, %p484_p0 }
  0x4a   :  { %370 = vmatpush3.bf16.msra.mxu0 %v369_v7 }
  0x4b   :  { %376 = vmatpush3.bf16.msra.mxu1 %v375_v26  ;;  %v167_v31 = vstv %s65_s3  ;;  %p487_p3 = pnand %p486_p2, %p480_p13 }
  0x4d   :  { %352 = vmatmul.mubr.msk.f32.vlgmr.msra.gmra.mrb[0].mxu0 %vm83_vm1, %v71_v9  ;;  %v284_v62 = vstv %s324_s5 }
 0x120   :  { %v153_v13 = vpop.f32.mrb[0].mxu0 }
 0x121   :  { %v154_v14 = vadd.f32 %v325_v12, %v153_v13  ;;  %v353_v15 = vpop.f32.mrb[1].mxu0 }
 0x123   :  { %v157_v16 = vsel %vm70_vm2, %v154_v14, 0.0  ;;  %v171_v17 = vsel %vm70_vm2, 0.0, %v154_v14 }
 0x124   :  { %v158_v18 = vsel %vm83_vm1, %v157_v16, 0.0  ;;  %v172_v19 = vmul.f32 %v171_v17, %v171_v17 }
 0x125   :  { %159 = vadd.xlane.f32.xlu0 %v158_v18 }
 0x126   :  { %v173_v20 = vsel %vm83_vm1, %v172_v19, 0.0 }
 0x129   :  { %174 = vadd.xlane.f32.xlu0 %v173_v20 }
 0x1b2   :  { %v160_v27 = vpop.xlane.xlu0 %159 }
 0x1b3   :  { %v327_v28 = vmul.f32 -1.442695, %v160_v27 }
 0x1b5   :  { %387 = vpow2.f32 %v327_v28 }
 0x1b6   :  { %v175_v37 = vpop.xlane.xlu0 %174 }
 0x1b7   :  { %v176_v39 = vmax.f32 %v175_v37, 1e-08 }
 0x1bf   :  { %v388_v29 = vpop.eup %387 }
 0x1c0   :  { %v164_v30 = vadd.f32 1.0, %v388_v29 }
 0x1c2   :  { %389 = vrcp.f32 %v164_v30 }
 0x1cc   :  { %v390_v32 = vpop.eup %389 }
 0x1cd   :  { %v168_v33 = vmul.f32 %v390_v32, %v167_v31 }
 0x1cf   :  { %v169_v34 = vadd.f32 1.0, %v168_v33 }
 0x1d1   :  { %v170_v35 = vadd.f32 0.0001, %v169_v34 }
 0x1d3   :  { %v177_v36 = vmul.f32 %v170_v35, %v170_v35 }
 0x1d5   :  { %v328_v38 = vadd.f32 -1.0, %v177_v36 }
 0x1d7   :  { %391 = vrsqrt.f32 %v328_v38  ;;  %vm181_vm3 = vcmp.eq.f32.partialorder %v328_v38, inf  ;;  %v184_v42 = vand.u32 2147483648, %v328_v38  ;;  %vm183_vm4 = vcmp.eq.f32.partialorder %v328_v38, 0.0 }
 0x1d8   :  { %393 = vrsqrt.f32 %v176_v39 }
 0x1e1   :  { %v392_v40 = vpop.eup %391 }
 0x1e2   :  { %v180_v41 = vmul.f32 %v392_v40, %v328_v38  ;;  %v394_v44 = vpop.eup %393 }
 0x1e4   :  { %v182_v43 = vsel %vm181_vm3, %v328_v38, %v180_v41 }
 0x1e5   :  { %v185_v45 = vsel %vm183_vm4, %v184_v42, %v182_v43 }
 0x1e6   :  { %v187_v46 = vmul.f32 %v394_v44, %v185_v45 }
 0x1e8   :  { %v188_v47 = vmul.f32 %v187_v46, %v154_v14 }
 0x1ea   :  { %v189_v48 = vsel %vm70_vm2, %v170_v35, %v188_v47 }
 0x1eb   :  { %363 = vmatmul.mubr.msk.f32.vlgmr.msra.gmra.mrb[0].mxu1 %vm83_vm1, %v189_v48 }
 0x2be   :  { %v270_v50 = vpop.f32.mrb[0].mxu1 }
 0x2bf   :  { %v271_v51 = vadd.f32 %v329_v49, %v270_v50  ;;  %v364_v52 = vpop.f32.mrb[1].mxu1 }
 0x2c1   :  { %v274_v53 = vsel %vm70_vm2, %v271_v51, 0.0  ;;  %v288_v54 = vsel %vm70_vm2, 0.0, %v271_v51 }
 0x2c2   :  { %v275_v55 = vsel %vm83_vm1, %v274_v53, 0.0  ;;  %v289_v56 = vmul.f32 %v288_v54, %v288_v54 }
 0x2c3   :  { %276 = vadd.xlane.f32.xlu1 %v275_v55 }
 0x2c4   :  { %v290_v57 = vsel %vm83_vm1, %v289_v56, 0.0 }
 0x2c7   :  { %291 = vadd.xlane.f32.xlu1 %v290_v57 }
 0x350   :  { %v277_v58 = vpop.xlane.xlu1 %276 }
 0x351   :  { %v331_v59 = vmul.f32 -1.442695, %v277_v58 }
 0x353   :  { %395 = vpow2.f32 %v331_v59 }
 0x354   :  { %v292_v4 = vpop.xlane.xlu1 %291 }
 0x355   :  { %v293_v6 = vmax.f32 %v292_v4, 1e-08 }
 0x35d   :  { %v396_v60 = vpop.eup %395 }
 0x35e   :  { %v281_v61 = vadd.f32 1.0, %v396_v60 }
 0x360   :  { %397 = vrcp.f32 %v281_v61 }
 0x36a   :  { %v398_v63 = vpop.eup %397 }
 0x36b   :  { %v285_v0 = vmul.f32 %v398_v63, %v284_v62 }
 0x36d   :  { %v286_v1 = vadd.f32 1.0, %v285_v0 }
 0x36f   :  { %v287_v2 = vadd.f32 0.0001, %v286_v1 }
 0x371   :  { %v294_v3 = vmul.f32 %v287_v2, %v287_v2 }
 0x373   :  { %v332_v5 = vadd.f32 -1.0, %v294_v3 }
 0x375   :  { %399 = vrsqrt.f32 %v332_v5  ;;  %vm298_vm5 = vcmp.eq.f32.partialorder %v332_v5, inf  ;;  %v301_v9 = vand.u32 2147483648, %v332_v5  ;;  %vm300_vm6 = vcmp.eq.f32.partialorder %v332_v5, 0.0 }
 0x376   :  { %401 = vrsqrt.f32 %v293_v6 }
 0x37f   :  { %v400_v7 = vpop.eup %399 }
 0x380   :  { %v297_v8 = vmul.f32 %v400_v7, %v332_v5  ;;  %v402_v12 = vpop.eup %401 }
 0x382   :  { %v299_v10 = vsel %vm298_vm5, %v332_v5, %v297_v8 }
 0x383   :  { %v302_v13 = vsel %vm300_vm6, %v301_v9, %v299_v10 }
 0x384   :  { %v304_v14 = vmul.f32 %v402_v12, %v302_v13 }
 0x386   :  { %v305_v15 = vmul.f32 %v304_v14, %v271_v51 }
 0x388   :  { %v306_v16 = vsel %vm70_vm2, %v287_v2, %v305_v15 }
 0x389   :  { %307 = vst.msk [vmem:[#allocation10] sm:$0xff] %vm83_vm1, %v306_v16 }
 0x38a   :  { %490 = shalt.err (!%p487_p3)
}
 0x38b   :  { %s491_s25 = scalar_lea.hbm %s654_s6, 128 }
 0x38c   :  { %p492_p4 = scmp.ne.s32.totalorder %s654_s6, %s491_s25  ;;  %p495_p5 = scmp.lt.u32.totalorder %s491_s25, %s654_s6 }
 0x38e   :  { %p497_p6 = pnand %p495_p5, %p492_p4 }
 0x390   :  { %500 = shalt.err (!%p497_p6)
}
 0x391   :  { %317 = dma.vmem_to_hbm [thread:$0]  %s315_s21, 128, %s654_s6, [#allocation6]  }
 0x392   :  { %507 = dma.done.wait [#allocation6], 128  }
 0x393   :  { %508 = vsyncadd [#allocation6], 4294967168 }
 0x394   :  { %321 = vsyncpa [#allocation5], 1 }
 0x395   :  { %322 = vsyncpa [#allocation8], 1 }
 0x396   :  { %323 = vsyncpa [#allocation6], 1 }

</bundles_post_ra>
